<compile_context>
chip_gen: v5e
topology: v5e:2x2
jax: 0.10.0
libtpu: 0.0.40
codegen_flags: <defaults>
</compile_context>

<pallas_src>
import math

import jax
import jax.numpy as jnp
from jax.experimental import pallas as pl
from jax.experimental.pallas import tpu as pltpu

# ---- sizes (small, consistent with the Linear(20, 2) head) ----
B = 8        # batch
D_IN = 32    # synthetic siamese input feature dim
H = 32       # synthetic siamese hidden dim
EMB = 20     # siamese embedding dim (fixed by the discrimination head)
OUT = 2      # discriminator output dim
LANE = 128   # TPU lane width; slab / output padded to this

# merged slab row layout
_W2D_ROW = D_IN                 # rows [D_IN : D_IN+LANE]  = w2 @ wd
_BIAS_ROW = D_IN + LANE         # rows [D_IN+LANE : +8]    = biases (row 0=b1, row 1=bd)
_SLAB_ROWS = D_IN + LANE + 8    # 168: multiple of 8 (sublane aligned)


def discriminator_kernel(x1_ref, x2_ref, w_ref, o_ref):
    """Shared-weight siamese encoder + folded discrimination head, one kernel.

    x1_ref, x2_ref: (B, D_IN)       the two siamese branch inputs
    w_ref:          (168, LANE)     rows [0:D_IN]        = w1   (zero-padded lanes)
                                    rows [D_IN:D_IN+128] = w2@wd (zero-padded)
                                    row  D_IN+128        = b1   (zero-padded)
                                    row  D_IN+129        = bd   (zero-padded)
    o_ref:          (B, LANE)       lane-dense sigmoid output; cols [0:OUT] real
    """
    w1 = w_ref[0:D_IN, :]                              # (D_IN, LANE)
    w2d = w_ref[_W2D_ROW:_W2D_ROW + LANE, :]           # (LANE, LANE), [0:H,0:OUT] nonzero
    b1 = w_ref[_BIAS_ROW:_BIAS_ROW + 1, :]             # (1, LANE)
    bd = w_ref[_BIAS_ROW + 1:_BIAS_ROW + 2, :]         # (1, LANE)

    # Shared-weight layer 1, one tiny MXU pass per branch (no wrapper concat).
    h1 = jnp.maximum(
        jnp.dot(x1_ref[...], w1, preferred_element_type=jnp.float32) + b1, 0.0)
    h2 = jnp.maximum(
        jnp.dot(x2_ref[...], w1, preferred_element_type=jnp.float32) + b1, 0.0)

    # b2 cancels in e1 - e2 (layer 2 is linear), so the diff of hidden
    # activations feeds the exactly-folded head w2d = w2 @ wd.
    d = h1 - h2                                        # (B, LANE); padded lanes exactly 0

    logits = jnp.dot(d, w2d, preferred_element_type=jnp.float32) + bd  # (B, LANE)

    # Sigmoid via the tanh identity: a single EUP push, no VPU divide.
    o_ref[...] = (0.5 * (jnp.tanh(0.5 * logits) + 1.0)).astype(o_ref.dtype)


def pack_params(params):
    """Fold layer 2 into the head and pack all params into ONE padded slab.

    Call this ONCE when parameters are loaded — it is not on the hot path.
    """
    w1, b1, w2, b2, wd, bd = params
    # Exact folding: (e1 - e2) @ wd == (h1 - h2) @ (w2 @ wd)   (b2 cancels).
    w2d = w2 @ wd                                          # (H, OUT)

    slab = jnp.zeros((_SLAB_ROWS, LANE), jnp.float32)
    slab = slab.at[:D_IN, :H].set(w1)
    slab = slab.at[_W2D_ROW:_W2D_ROW + H, :OUT].set(w2d)
    slab = slab.at[_BIAS_ROW, :H].set(b1[0])
    slab = slab.at[_BIAS_ROW + 1, :OUT].set(bd[0])
    return slab


@jax.jit
def discriminator_forward(x1, x2, w_slab):
    """Hot path: one pallas_call + output slice, dispatched as one XLA program."""
    vmem = pl.BlockSpec(memory_space=pltpu.MemorySpace.VMEM)
    out_pad = pl.pallas_call(
        discriminator_kernel,
        out_shape=jax.ShapeDtypeStruct((B, LANE), jnp.float32),
        in_specs=[vmem, vmem, vmem],
        out_specs=vmem,
    )(x1, x2, w_slab)
    return out_pad[:, :OUT]


def init_params(key):
    """PyTorch-style Linear init: U(-1/sqrt(fan_in), 1/sqrt(fan_in)); weights
    stored transposed as (in, out) for x @ W."""
    def linear(k, fan_in, fan_out):
        kw, kb = jax.random.split(k)
        bound = 1.0 / math.sqrt(fan_in)
        w = jax.random.uniform(kw, (fan_in, fan_out), jnp.float32, -bound, bound)
        b = jax.random.uniform(kb, (1, fan_out), jnp.float32, -bound, bound)
        return w, b

    k1, k2, k3 = jax.random.split(key, 3)
    # TODO(synk): siamese_net architecture is injected in PyTorch and not defined
    # in this module; a shared-weight 2-layer MLP encoder is used as a stand-in.
    w1, b1 = linear(k1, D_IN, H)    # siamese layer 1 (shared)
    w2, b2 = linear(k2, H, EMB)     # siamese layer 2 (shared) -> 20-dim embedding
    wd, bd = linear(k3, EMB, OUT)   # discrimination_net Linear(20, 2)
    return (w1, b1, w2, b2, wd, bd)


def reference_forward(x1, x2, params):
    """Pure-JAX reference of the ORIGINAL (un-folded) forward pass."""
    w1, b1, w2, b2, wd, bd = params

    def embed(x):
        h = jnp.maximum(x @ w1 + b1, 0.0)
        return h @ w2 + b2

    d = embed(x1) - embed(x2)
    logits = d @ wd + bd
    return 1.0 / (1.0 + jnp.exp(-logits))


if __name__ == "__main__":
    key = jax.random.PRNGKey(0)
    kp, kx1, kx2 = jax.random.split(key, 3)
    params = init_params(kp)

    # Packed once here (parameter-load time), NOT per forward call.
    w_slab = jax.block_until_ready(pack_params(params))

    x1 = jax.random.normal(kx1, (B, D_IN), jnp.float32)
    x2 = jax.random.normal(kx2, (B, D_IN), jnp.float32)

    out = discriminator_forward(x1, x2, w_slab)
    out = jax.block_until_ready(out)

    ref = reference_forward(x1, x2, params)
    assert out.shape == (B, OUT), out.shape
    assert jnp.allclose(out, ref, atol=1e-5, rtol=1e-5), (out, ref)

    print("KERNEL_OK")
</pallas_src>

<mosaic_0001>
module attributes {stable_mosaic.version = 11 : i64} {
  func.func @discriminator_kernel(%arg0: memref<8x32xf32, #tpu.memory_space<vmem>>, %arg1: memref<8x32xf32, #tpu.memory_space<vmem>>, %arg2: memref<168x128xf32, #tpu.memory_space<vmem>>, %arg3: memref<8x128xf32, #tpu.memory_space<vmem>>) attributes {dimension_semantics = [], scalar_prefetch = 0 : i64, scratch_operands = 0 : i64, tpu.core_type = #tpu.core_type<tc>} {
    %c0 = arith.constant 0 : index
    %c0_0 = arith.constant 0 : index
    %0 = vector.load %arg2[%c0, %c0_0] : memref<168x128xf32, #tpu.memory_space<vmem>>, vector<32x128xf32>
    %c32 = arith.constant 32 : index
    %c0_1 = arith.constant 0 : index
    %1 = vector.load %arg2[%c32, %c0_1] : memref<168x128xf32, #tpu.memory_space<vmem>>, vector<128x128xf32>
    %c160 = arith.constant 160 : index
    %c0_2 = arith.constant 0 : index
    %2 = vector.load %arg2[%c160, %c0_2] : memref<168x128xf32, #tpu.memory_space<vmem>>, vector<1x128xf32>
    %c161 = arith.constant 161 : index
    %c0_3 = arith.constant 0 : index
    %3 = vector.load %arg2[%c161, %c0_3] : memref<168x128xf32, #tpu.memory_space<vmem>>, vector<1x128xf32>
    %c0_4 = arith.constant 0 : index
    %c0_5 = arith.constant 0 : index
    %4 = vector.load %arg0[%c0_4, %c0_5] : memref<8x32xf32, #tpu.memory_space<vmem>>, vector<8x32xf32>
    %cst = arith.constant dense<0.000000e+00> : vector<8x128xf32>
    %5 = tpu.matmul %4, %0, %cst {dimension_numbers = #tpu.dot_dimension_numbers<[1], [0], [0], [1], [0, 0, 1, 1], [], []>} : vector<8x32xf32>, vector<32x128xf32>, vector<8x128xf32> -> vector<8x128xf32>
    %6 = vector.broadcast %2 : vector<1x128xf32> to vector<8x128xf32>
    %7 = arith.addf %5, %6 : vector<8x128xf32>
    %cst_6 = arith.constant 0.000000e+00 : f32
    %8 = vector.broadcast %cst_6 : f32 to vector<8x128xf32>
    %9 = arith.maximumf %7, %8 : vector<8x128xf32>
    %c0_7 = arith.constant 0 : index
    %c0_8 = arith.constant 0 : index
    %10 = vector.load %arg1[%c0_7, %c0_8] : memref<8x32xf32, #tpu.memory_space<vmem>>, vector<8x32xf32>
    %cst_9 = arith.constant dense<0.000000e+00> : vector<8x128xf32>
    %11 = tpu.matmul %10, %0, %cst_9 {dimension_numbers = #tpu.dot_dimension_numbers<[1], [0], [0], [1], [0, 0, 1, 1], [], []>} : vector<8x32xf32>, vector<32x128xf32>, vector<8x128xf32> -> vector<8x128xf32>
    %12 = vector.broadcast %2 : vector<1x128xf32> to vector<8x128xf32>
    %13 = arith.addf %11, %12 : vector<8x128xf32>
    %cst_10 = arith.constant 0.000000e+00 : f32
    %14 = vector.broadcast %cst_10 : f32 to vector<8x128xf32>
    %15 = arith.maximumf %13, %14 : vector<8x128xf32>
    %16 = arith.subf %9, %15 : vector<8x128xf32>
    %cst_11 = arith.constant dense<0.000000e+00> : vector<8x128xf32>
    %17 = tpu.matmul %16, %1, %cst_11 {dimension_numbers = #tpu.dot_dimension_numbers<[1], [0], [0], [1], [0, 0, 1, 1], [], []>} : vector<8x128xf32>, vector<128x128xf32>, vector<8x128xf32> -> vector<8x128xf32>
    %18 = vector.broadcast %3 : vector<1x128xf32> to vector<8x128xf32>
    %19 = arith.addf %17, %18 : vector<8x128xf32>
    %cst_12 = arith.constant 5.000000e-01 : f32
    %20 = vector.broadcast %cst_12 : f32 to vector<8x128xf32>
    %21 = arith.mulf %20, %19 : vector<8x128xf32>
    %22 = math.tanh %21 : vector<8x128xf32>
    %cst_13 = arith.constant 1.000000e+00 : f32
    %23 = vector.broadcast %cst_13 : f32 to vector<8x128xf32>
    %24 = arith.addf %22, %23 : vector<8x128xf32>
    %cst_14 = arith.constant 5.000000e-01 : f32
    %25 = vector.broadcast %cst_14 : f32 to vector<8x128xf32>
    %26 = arith.mulf %25, %24 : vector<8x128xf32>
    %c0_15 = arith.constant 0 : index
    %c0_16 = arith.constant 0 : index
    %27 = vector.load %arg3[%c0_15, %c0_16] : memref<8x128xf32, #tpu.memory_space<vmem>>, vector<8x128xf32>
    tpu.vector_store %arg3[%c0_15, %c0_16], %26 {strides = array<i32>} : memref<8x128xf32, #tpu.memory_space<vmem>>, vector<8x128xf32>,
    return
  }
}

</mosaic_0001>

<bundles_post_ra>
// kernel: discriminator_forward.1
= control target key start
LH: loop header
LB: loop body
LE: loop exit
PB: predicated region body
PF: predicated region fallthrough
CT: control target
= control target key end

     0   :  { %8 = vsyncpa [#allocation3], 0  ;;  %s288_s0 = inlined_call_operand.hbm [shape: f32[8,32], index: 0, kind: input, shape index: {}]   ;;  %s289_s1 = inlined_call_operand.hbm [shape: f32[8,32], index: 1, kind: input, shape index: {}]   ;;  %s290_s2 = inlined_call_operand.hbm [shape: f32[168,128], index: 2, kind: input, shape index: {}]   ;;  %s291_s3 = inlined_call_operand.vmem [shape: f32[8,128], index: 3, kind: output, shape index: {}]  }
   0x1   :  { %9 = vsyncpa [#allocation5], 0  ;;  %s26_s14 = sshll.u32 %s289_s1, 4  ;;  %s251_s15 = smov [#allocation4]   ;;  %s27_s14 = int_to_ptr.hbm [resolvable:$true] %s26_s14 }
   0x2   :  { %s28_s16 = sshll.u32 %s251_s15, 4  ;;  %s15_s19 = sshll.u32 %s288_s0, 4  ;;  %s29_s16 = int_to_ptr.vmem [resolvable:$true] %s28_s16  ;;  %s16_s19 = int_to_ptr.hbm [resolvable:$true] %s15_s19 }
   0x3   :  { %31 = dma.hbm_to_vmem [thread:$0]  %s27_s14, 128, %s29_s16, [#allocation5]  }
   0x4   :  { %s252_s20 = smov [#allocation2]   ;;  %s36_s24 = sshll.u32 %s290_s2, 4  ;;  %s37_s24 = int_to_ptr.hbm [resolvable:$true] %s36_s24 }
   0x5   :  { %s17_s21 = sshll.u32 %s252_s20, 4  ;;  %s253_s1 = smov [#allocation6]   ;;  %s18_s21 = int_to_ptr.vmem [resolvable:$true] %s17_s21 }
   0x6   :  { %20 = dma.hbm_to_vmem [thread:$0]  %s16_s19, 128, %s18_s21, [#allocation3]  }
   0x7   :  { %s38_s25 = sshll.u32 %s253_s1, 4  ;;  %s254_s26 = smov 128   ;;  %s39_s25 = int_to_ptr.vmem [resolvable:$true] %s38_s25 }
   0x8   :  { %s255_s27 = smov 8  }
   0x9   :  { %44 = dma.hbm_to_vmem [thread:$0]  %s37_s24, 2688, %s39_s25, [#allocation5], %s254_s26, %s254_s26, %s255_s27  }
   0xa   :  { %247 = dma.done.wait [#allocation3], 128  }
   0xb   :  { %248 = vsyncadd [#allocation3], 4294967168 }
   0xc   :  { %249 = dma.done.wait [#allocation5], 2816  }
   0xd   :  { %250 = vsyncadd [#allocation5], 4294964480  ;;  %v60_v0 = vld [vmem:[#allocation6 + $0x18] sm:$0xff]  ;;  %v59_v1 = vld [vmem:[#allocation6 + $0x10] sm:$0xff]  ;;  %vm81_vm0 = vcmask 261120  }
   0xe   :  { %97 = vmatpush.msra.mxu0 %v60_v0  ;;  %122 = vmatpush.msra.mxu1 %v60_v0  ;;  %v58_v2 = vld [vmem:[#allocation6 + $0x8] sm:$0xff]  ;;  %v76_v3 = vld [vmem:[#allocation6 + $0x98] sm:$0xff]  ;;  %v75_v4 = vld [vmem:[#allocation6 + $0x90] sm:$0xff] }
   0xf   :  { %v57_v5 = vld [vmem:[#allocation6] sm:$0xff]  ;;  %133 = vmatpush.msra.mxu2 %v76_v3  ;;  %v79_v6 = vld [vmem:[#allocation2] sm:$0xff]  ;;  %v106_v7 = vld [vmem:[#allocation4] sm:$0xff] }
  0x10   :  { %98 = vmatpush.msra.mxu0 %v59_v1  ;;  %123 = vmatpush.msra.mxu1 %v59_v1  ;;  %v74_v8 = vld [vmem:[#allocation6 + $0x88] sm:$0xff]  ;;  %v73_v9 = vld [vmem:[#allocation6 + $0x80] sm:$0xff]  ;;  %v72_v10 = vld [vmem:[#allocation6 + $0x78] sm:$0xff] }
  0x11   :  { %134 = vmatpush.msra.mxu2 %v75_v4  ;;  %v71_v11 = vld [vmem:[#allocation6 + $0x70] sm:$0xff]  ;;  %v70_v12 = vld [vmem:[#allocation6 + $0x68] sm:$0xff]  ;;  %v69_v13 = vld [vmem:[#allocation6 + $0x60] sm:$0xff] }
  0x12   :  { %99 = vmatpush.msra.mxu0 %v58_v2  ;;  %124 = vmatpush.msra.mxu1 %v58_v2  ;;  %v68_v14 = vld [vmem:[#allocation6 + $0x58] sm:$0xff]  ;;  %v67_v15 = vld [vmem:[#allocation6 + $0x50] sm:$0xff]  ;;  %v66_v16 = vld [vmem:[#allocation6 + $0x48] sm:$0xff] }
  0x13   :  { %135 = vmatpush.msra.mxu2 %v74_v8  ;;  %v65_v17 = vld [vmem:[#allocation6 + $0x40] sm:$0xff]  ;;  %v64_v18 = vld [vmem:[#allocation6 + $0x38] sm:$0xff]  ;;  %v63_v19 = vld [vmem:[#allocation6 + $0x30] sm:$0xff] }
  0x14   :  { %100 = vmatpush.msra.mxu0 %v57_v5  ;;  %125 = vmatpush.msra.mxu1 %v57_v5  ;;  %v62_v20 = vld [vmem:[#allocation6 + $0x28] sm:$0xff]  ;;  %v61_v21 = vld [vmem:[#allocation6 + $0x20] sm:$0xff] }
  0x15   :  { %164 = vmatmul.msk.f32.vlgmr.msra.gmra.mxu0 %vm81_vm0, %v79_v6  ;;  %165 = vmatmul.msk.f32.vlgmr.msra.gmra.mxu1 %vm81_vm0, %v106_v7  ;;  %v171_v22 = vld [vmem:[#allocation6 + $0xa0] ss:$0 sm:$0xff]  ;;  %v172_v30 = vld [vmem:[#allocation6 + $0xa1] ss:$0 sm:$0xff] }
  0x16   :  { %136 = vmatpush.msra.mxu2 %v73_v9 }
  0x18   :  { %137 = vmatpush.msra.mxu2 %v72_v10 }
  0x1a   :  { %138 = vmatpush.msra.mxu2 %v71_v11 }
  0x1c   :  { %139 = vmatpush.msra.mxu2 %v70_v12 }
  0x1e   :  { %140 = vmatpush.msra.mxu2 %v69_v13 }
  0x20   :  { %141 = vmatpush.msra.mxu2 %v68_v14 }
  0x22   :  { %142 = vmatpush.msra.mxu2 %v67_v15 }
  0x24   :  { %143 = vmatpush.msra.mxu2 %v66_v16 }
  0x26   :  { %144 = vmatpush.msra.mxu2 %v65_v17 }
  0x28   :  { %145 = vmatpush.msra.mxu2 %v64_v18 }
  0x2a   :  { %146 = vmatpush.msra.mxu2 %v63_v19 }
  0x2c   :  { %147 = vmatpush.msra.mxu2 %v62_v20 }
  0x2e   :  { %148 = vmatpush.msra.mxu2 %v61_v21 }
  0x92   :  { %v102_v23 = vpop.f32.mrf.mxu0  ;;  %v127_v24 = vpop.f32.mrf.mxu1 }
  0x93   :  { %v103_v25 = vadd.f32 %v171_v22, %v102_v23  ;;  %v128_v26 = vadd.f32 %v171_v22, %v127_v24 }
  0x95   :  { %v105_v27 = vmax.f32 %v103_v25, 0.0  ;;  %v130_v28 = vmax.f32 %v128_v26, 0.0 }
  0x97   :  { %v131_v29 = vsub.f32 %v105_v27, %v130_v28 }
  0x99   :  { %149 = vmatmul.f32.vlgmr.msra.gmra.mxu2 %v131_v29 }
 0x11c   :  { %v150_v31 = vpop.f32.mrf.mxu2 }
 0x11d   :  { %v151_v32 = vadd.f32 %v172_v30, %v150_v31 }
 0x11f   :  { %v153_v33 = vmul.f32 0.5, %v151_v32 }
 0x121   :  { %173 = vtanh.f32 %v153_v33 }
 0x127   :  { %v174_v34 = vpop.eup %173 }
 0x128   :  { %v155_v35 = vadd.f32 1.0, %v174_v34 }
 0x12a   :  { %v156_v36 = vmul.f32 0.5, %v155_v35 }
 0x12c   :  { %157 = vst [vmem:[%s291_s3] sm:$0xff] %v156_v36 }
 0x12d   :  { %162 = vsyncpa [#allocation3], 1 }
 0x12e   :  { %163 = vsyncpa [#allocation5], 1 }

</bundles_post_ra>
